<compile_context>
chip_gen: v7x
topology: tpu7x:2x2x1
jax: 0.10.0
libtpu: 0.0.40
codegen_flags: <defaults>
</compile_context>

<pallas_src>
from functools import partial

import jax
import jax.numpy as jnp
from jax.experimental import pallas as pl
from jax.experimental.pallas import tpu as pltpu


# ----------------------------------------------------------------------------- kernel ---
def decoder_kernel(z_ref, wfc_ref, bfc_ref,
                   w1_ref, g1_ref, be1_ref,
                   w2_ref, g2_ref, be2_ref,
                   w3_ref, b3_ref, kp_ref, kn_ref,
                   out_ref, *, B, L0):
    f32 = jnp.float32
    N = B * L0
    kp = kp_ref[...]   # (N, 1) keep-mask: 0 at the first row of each batch, else 1
    kn = kn_ref[...]   # (N, 1) keep-mask: 0 at the last  row of each batch, else 1

    def leaky(x):
        return jnp.where(x >= 0, x, 0.2 * x)

    def conv_block(x, w_ref, P):
        # x: (N, 128) f32, P phase blocks of Cin = 128 // P channels (phase-major packed).
        # One block matmul computes all 2P output phases at once:
        #   x_ext = [x | shift_prev(phase P-1) | shift_next(phase 0)]   (N, (P+2)*Cin)
        #   y     = x_ext @ W_big                                       (N, 2P*Cout) f32
        Cin = 128 // P
        p_last = x[:, (P - 1) * Cin:]
        p_first = x[:, :Cin]
        # TODO(synk): pltpu.roll(blk, 1, axis=0) would move these two row shifts to the
        # XLU; kept as slice+concat (proven lowering) -- only 2 small copies per layer.
        sp = jnp.concatenate([p_last[-1:], p_last[:-1]], axis=0) * kp
        sn = jnp.concatenate([p_first[1:], p_first[:1]], axis=0) * kn
        x_ext = jnp.concatenate([x, sp, sn], axis=-1).astype(jnp.bfloat16)
        return jnp.dot(x_ext, w_ref[...], preferred_element_type=f32)

    def bn_leaky(y, g_ref, be_ref, P, eps=1e-5):
        # Training-mode BatchNorm1d on the packed (N, 128) layout (P phase blocks of
        # C = 128 // P channels).  One row reduction per statistic; the P phase blocks
        # are folded with lane rolls -- the folded (1,128) vector is C-periodic, i.e.
        # already phase-tiled for broadcasting back.  Two-pass (centered) variance.
        inv_n = 1.0 / float(N * P)

        def fold(v):
            step, p = 64, P
            while p > 1:
                v = v + pltpu.roll(v, shift=step, axis=1)
                p //= 2
                step //= 2
            return v

        mean = fold(jnp.sum(y, axis=0, keepdims=True)) * inv_n
        yc = y - mean
        var = fold(jnp.sum(yc * yc, axis=0, keepdims=True)) * inv_n
        scale = g_ref[...] * jax.lax.rsqrt(var + eps)
        return leaky(yc * scale + be_ref[...])

    # ---------------- fc + LeakyReLU ----------------
    # fc weight/bias columns pre-permuted in the wrapper (index l*128 + c), so the reshape
    # below is exactly the channels-last packed view of torch's h.view(B, 128, L0).
    h = jnp.dot(z_ref[...], wfc_ref[...], preferred_element_type=f32) + bfc_ref[...]
    h = leaky(h)
    # (B, L0*128) -> (B*L0, 128): the one remaining relayout (lane blocks -> sublane
    # rows); L0 % 8 == 0 keeps the leading-dim collapse layout-trivial.
    x = h.reshape(B, L0, 128).reshape(N, 128)

    # conv1: 128 -> 64 ch, 1 -> 2 phases.  conv bias dropped: cancels exactly against the
    # following training-mode BatchNorm mean subtraction (eval-mode would need it back).
    x = bn_leaky(conv_block(x, w1_ref, P=1), g1_ref, be1_ref, P=2)
    # conv2: 64 -> 32 ch, 2 -> 4 phases (bias dropped, same reason).
    x = bn_leaky(conv_block(x, w2_ref, P=2), g2_ref, be2_ref, P=4)
    # conv3: 32 -> 1 ch, 4 -> 8 phases; the matmul result IS the (N, 8) phase-packed
    # output slab (bias kept, single contiguous store).
    out_ref[...] = conv_block(x, w3_ref, P=4) + b3_ref[...]


# ------------------------------------------------------------------------- weight prep ---
def _convT_block_weight(w, P):
    """ConvTranspose1d(k=4, s=2, p=1) as one block matmul on the phase-packed layout.

    w: (Cin, Cout, 4) PyTorch ConvTranspose1d weight.  Returns ((P+2)*Cin, 2P*Cout) bf16:
    row blocks 0..P-1 multiply the P input-phase blocks, block P the prev-shifted last
    phase, block P+1 the next-shifted first phase; output column block s = output phase s.
      out[2m]   = u[m] @ W1 + u[m-1] @ W3
      out[2m+1] = u[m] @ W2 + u[m+1] @ W0
    """
    Cin, Cout, K = w.shape
    assert K == 4
    Wb = jnp.zeros(((P + 2) * Cin, 2 * P * Cout), jnp.float32)

    def put(Wb, rb, sb, k):
        return Wb.at[rb * Cin:(rb + 1) * Cin, sb * Cout:(sb + 1) * Cout].set(w[:, :, k])

    for r in range(P):
        Wb = put(Wb, r, 2 * r, 1)                                   # u[m]   @ W1 -> even
        Wb = put(Wb, r - 1 if r > 0 else P, 2 * r, 3)               # u[m-1] @ W3 -> even
        Wb = put(Wb, r, 2 * r + 1, 2)                               # u[m]   @ W2 -> odd
        Wb = put(Wb, r + 1 if r < P - 1 else P + 1, 2 * r + 1, 0)   # u[m+1] @ W0 -> odd
    return Wb.astype(jnp.bfloat16)


def _vmem_limit_bytes():
    # Generation-aware scoped-VMEM limit: ~5/8 of physical, capped at 96 MiB
    # (=> ~40 MiB on v7x's 64 MiB VMEM, 80 MiB on v5e/v6e's 128 MiB).
    cap = 64 * 1024 * 1024
    try:
        info = pltpu.get_tpu_info()
        c = int(getattr(info, "vmem_capacity_bytes", 0))
        if c > 0:
            cap = c
    except Exception:
        pass
    return int(min(cap * 5 // 8, 96 * 1024 * 1024))


# ----------------------------------------------------------------------------- wrapper ---
def init_params(key, latent_dim, output_length):
    L0 = output_length // 8
    ks = jax.random.split(key, 8)
    return {
        # nn.Linear(latent_dim, 128 * L0): weight (out, in), bias (out,)
        "fc_w": jax.random.normal(ks[0], (128 * L0, latent_dim), jnp.float32) * 0.1,
        "fc_b": jax.random.normal(ks[1], (128 * L0,), jnp.float32) * 0.01,
        # ConvTranspose1d weights: (Cin, Cout, K)
        "w1": jax.random.normal(ks[2], (128, 64, 4), jnp.float32) * 0.05,
        "b1": jax.random.normal(ks[3], (64,), jnp.float32) * 0.01,
        "g1": jnp.ones((64,), jnp.float32),
        "be1": jnp.zeros((64,), jnp.float32),
        "w2": jax.random.normal(ks[4], (64, 32, 4), jnp.float32) * 0.05,
        "b2": jax.random.normal(ks[5], (32,), jnp.float32) * 0.01,
        "g2": jnp.ones((32,), jnp.float32),
        "be2": jnp.zeros((32,), jnp.float32),
        "w3": jax.random.normal(ks[6], (32, 1, 4), jnp.float32) * 0.05,
        "b3": jax.random.normal(ks[7], (1,), jnp.float32) * 0.01,
    }


def decoder_forward(z, params, output_length):
    B, latent = z.shape
    assert output_length % 8 == 0
    L0 = output_length // 8
    # Kernel perf requirement (flat 2D layout, layout-trivial reshapes): L0 % 8 == 0.
    assert L0 % 8 == 0, "decoder kernel requires output_length % 64 == 0"
    N = B * L0

    # fc columns permuted (index l*128 + c <-> torch feature c*L0 + l) so the in-kernel
    # reshape of the fc output gives the packed channels-last activation directly.
    w_fc = (params["fc_w"].T.reshape(latent, 128, L0)
            .transpose(0, 2, 1).reshape(latent, L0 * 128)).astype(jnp.bfloat16)
    b_fc = params["fc_b"].reshape(128, L0).T.reshape(1, L0 * 128).astype(jnp.float32)

    w1 = _convT_block_weight(params["w1"], P=1)        # (384, 128)
    w2 = _convT_block_weight(params["w2"], P=2)        # (256, 128)
    w3 = _convT_block_weight(params["w3"], P=4)        # (192,   8)

    # BN scale/shift pre-tiled across the phase blocks of the packed 128-lane layout.
    g1 = jnp.tile(params["g1"], 2).reshape(1, 128)
    be1 = jnp.tile(params["be1"], 2).reshape(1, 128)
    g2 = jnp.tile(params["g2"], 4).reshape(1, 128)
    be2 = jnp.tile(params["be2"], 4).reshape(1, 128)
    b3 = params["b3"].reshape(1, 1)

    # Batch-boundary keep masks for the row shifts (precomputed: no in-kernel int mod).
    rows = jnp.arange(N, dtype=jnp.int32) % L0
    keep_prev = (rows != 0).astype(jnp.float32).reshape(N, 1)
    keep_next = (rows != L0 - 1).astype(jnp.float32).reshape(N, 1)

    args = (z.astype(jnp.bfloat16), w_fc, b_fc,
            w1, g1, be1, w2, g2, be2, w3, b3, keep_prev, keep_next)

    out = pl.pallas_call(
        partial(decoder_kernel, B=B, L0=L0),
        out_shape=jax.ShapeDtypeStruct((N, 8), jnp.float32),
        in_specs=[pl.BlockSpec(memory_space=pltpu.MemorySpace.VMEM)] * len(args),
        out_specs=pl.BlockSpec(memory_space=pltpu.MemorySpace.VMEM),
        compiler_params=pltpu.CompilerParams(vmem_limit_bytes=_vmem_limit_bytes()),
    )(*args)

    # (B*L0, 8) row-major flatten == de-interleave of the 8 output phases -> PyTorch NCW.
    return out.reshape(B, 1, output_length)


# --------------------------------------------------------------------------- reference ---
def _reference_decoder(z, params, output_length):
    # Plain-JAX reference faithful to the PyTorch module (training-mode BN, biases kept).
    B = z.shape[0]
    L0 = output_length // 8
    h = z @ params["fc_w"].T + params["fc_b"]
    h = jnp.where(h >= 0, h, 0.2 * h)
    x = h.reshape(B, 128, L0)                                  # NCW

    def conv_transpose(x, w, b):                               # x:(B,Cin,L) w:(Cin,Cout,4)
        Bn, Cin, L = x.shape
        Cout = w.shape[1]
        Lout = 2 * L
        out = jnp.zeros((Bn, Cout, Lout), jnp.float32)
        for i in range(L):
            for k in range(4):
                t = 2 * i + k - 1
                if 0 <= t < Lout:
                    out = out.at[:, :, t].add(
                        jnp.einsum("bc,co->bo", x[:, :, i], w[:, :, k]))
        return out + b[None, :, None]

    def bn_lrelu(x, g, be, eps=1e-5):                          # x:(B,C,L)
        mean = jnp.mean(x, axis=(0, 2), keepdims=True)
        var = jnp.mean((x - mean) ** 2, axis=(0, 2), keepdims=True)
        xn = (x - mean) * jax.lax.rsqrt(var + eps)
        xn = xn * g[None, :, None] + be[None, :, None]
        return jnp.where(xn >= 0, xn, 0.2 * xn)

    y = conv_transpose(x, params["w1"], params["b1"])
    y = bn_lrelu(y, params["g1"], params["be1"])
    y = conv_transpose(y, params["w2"], params["b2"])
    y = bn_lrelu(y, params["g2"], params["be2"])
    y = conv_transpose(y, params["w3"], params["b3"])
    return y                                                   # (B, 1, output_length)


if __name__ == "__main__":
    latent_dim = 8
    output_length = 64            # kernel requires output_length % 64 == 0 (L0 = 8)
    batch = 4

    key = jax.random.PRNGKey(0)
    k_param, k_z = jax.random.split(key)
    params = init_params(k_param, latent_dim, output_length)
    z = jax.random.normal(k_z, (batch, latent_dim), jnp.float32)

    x_hat = decoder_forward(z, params, output_length)
    jax.block_until_ready(x_hat)
    assert x_hat.shape == (batch, 1, output_length), x_hat.shape

    # Numeric check vs. plain-JAX reference (loose tolerance: kernel matmuls run in bf16).
    x_ref = _reference_decoder(z, params, output_length)
    err = float(jnp.max(jnp.abs(x_hat - x_ref)))
    assert err < 5e-2, f"max abs err {err}"

    print("KERNEL_OK")
</pallas_src>

<mosaic_0001>
module attributes {stable_mosaic.version = 11 : i64} {
  func.func @decoder_kernel(%arg0: memref<4x8xbf16, #tpu.memory_space<vmem>>, %arg1: memref<8x1024xbf16, #tpu.memory_space<vmem>>, %arg2: memref<1x1024xf32, #tpu.memory_space<vmem>>, %arg3: memref<384x128xbf16, #tpu.memory_space<vmem>>, %arg4: memref<1x128xf32, #tpu.memory_space<vmem>>, %arg5: memref<1x128xf32, #tpu.memory_space<vmem>>, %arg6: memref<256x128xbf16, #tpu.memory_space<vmem>>, %arg7: memref<1x128xf32, #tpu.memory_space<vmem>>, %arg8: memref<1x128xf32, #tpu.memory_space<vmem>>, %arg9: memref<192x8xbf16, #tpu.memory_space<vmem>>, %arg10: memref<1x1xf32, #tpu.memory_space<vmem>>, %arg11: memref<32x1xf32, #tpu.memory_space<vmem>>, %arg12: memref<32x1xf32, #tpu.memory_space<vmem>>, %arg13: memref<32x8xf32, #tpu.memory_space<vmem>>) attributes {dimension_semantics = [], scalar_prefetch = 0 : i64, scratch_operands = 0 : i64, tpu.core_type = #tpu.core_type<tc>} {
    %c0 = arith.constant 0 : index
    %c0_0 = arith.constant 0 : index
    %0 = vector.load %arg11[%c0, %c0_0] : memref<32x1xf32, #tpu.memory_space<vmem>>, vector<32x1xf32>
    %c0_1 = arith.constant 0 : index
    %c0_2 = arith.constant 0 : index
    %1 = vector.load %arg12[%c0_1, %c0_2] : memref<32x1xf32, #tpu.memory_space<vmem>>, vector<32x1xf32>
    %c0_3 = arith.constant 0 : index
    %c0_4 = arith.constant 0 : index
    %2 = vector.load %arg0[%c0_3, %c0_4] : memref<4x8xbf16, #tpu.memory_space<vmem>>, vector<4x8xbf16>
    %c0_5 = arith.constant 0 : index
    %c0_6 = arith.constant 0 : index
    %3 = vector.load %arg1[%c0_5, %c0_6] : memref<8x1024xbf16, #tpu.memory_space<vmem>>, vector<8x1024xbf16>
    %cst = arith.constant dense<0.000000e+00> : vector<4x1024xf32>
    %4 = tpu.matmul %2, %3, %cst {dimension_numbers = #tpu.dot_dimension_numbers<[1], [0], [0], [1], [0, 0, 1, 1], [], []>} : vector<4x8xbf16>, vector<8x1024xbf16>, vector<4x1024xf32> -> vector<4x1024xf32>
    %c0_7 = arith.constant 0 : index
    %c0_8 = arith.constant 0 : index
    %5 = vector.load %arg2[%c0_7, %c0_8] : memref<1x1024xf32, #tpu.memory_space<vmem>>, vector<1x1024xf32>
    %6 = vector.broadcast %5 : vector<1x1024xf32> to vector<4x1024xf32>
    %7 = arith.addf %4, %6 : vector<4x1024xf32>
    %cst_9 = arith.constant 0.000000e+00 : f32
    %8 = vector.broadcast %cst_9 : f32 to vector<4x1024xf32>
    %9 = arith.cmpf oge, %7, %8 : vector<4x1024xf32>
    %cst_10 = arith.constant 2.000000e-01 : f32
    %10 = vector.broadcast %cst_10 : f32 to vector<4x1024xf32>
    %11 = arith.mulf %10, %7 : vector<4x1024xf32>
    %12 = arith.select %9, %7, %11 : vector<4x1024xi1>, vector<4x1024xf32>
    %13 = vector.shape_cast %12 : vector<4x1024xf32> to vector<4x8x128xf32>
    %14 = vector.shape_cast %13 : vector<4x8x128xf32> to vector<32x128xf32>
    %15 = vector.extract_strided_slice %14 {offsets = [31, 0], sizes = [1, 128], strides = [1, 1]} : vector<32x128xf32> to vector<1x128xf32>
    %16 = vector.extract_strided_slice %14 {offsets = [0, 0], sizes = [31, 128], strides = [1, 1]} : vector<32x128xf32> to vector<31x128xf32>
    %17 = tpu.concatenate %15, %16 in 0 : vector<1x128xf32>, vector<31x128xf32> -> vector<32x128xf32>
    %18 = vector.broadcast %0 : vector<32x1xf32> to vector<32x128xf32>
    %19 = arith.mulf %17, %18 : vector<32x128xf32>
    %20 = vector.extract_strided_slice %14 {offsets = [1, 0], sizes = [31, 128], strides = [1, 1]} : vector<32x128xf32> to vector<31x128xf32>
    %21 = vector.extract_strided_slice %14 {offsets = [0, 0], sizes = [1, 128], strides = [1, 1]} : vector<32x128xf32> to vector<1x128xf32>
    %22 = tpu.concatenate %20, %21 in 0 : vector<31x128xf32>, vector<1x128xf32> -> vector<32x128xf32>
    %23 = vector.broadcast %1 : vector<32x1xf32> to vector<32x128xf32>
    %24 = arith.mulf %22, %23 : vector<32x128xf32>
    %25 = tpu.concatenate %14, %19, %24 in 1 : vector<32x128xf32>, vector<32x128xf32>, vector<32x128xf32> -> vector<32x384xf32>
    %26 = arith.truncf %25 : vector<32x384xf32> to vector<32x384xbf16>
    %c0_11 = arith.constant 0 : index
    %c0_12 = arith.constant 0 : index
    %27 = vector.load %arg3[%c0_11, %c0_12] : memref<384x128xbf16, #tpu.memory_space<vmem>>, vector<384x128xbf16>
    %cst_13 = arith.constant dense<0.000000e+00> : vector<32x128xf32>
    %28 = tpu.matmul %26, %27, %cst_13 {dimension_numbers = #tpu.dot_dimension_numbers<[1], [0], [0], [1], [0, 0, 1, 1], [], []>} : vector<32x384xbf16>, vector<384x128xbf16>, vector<32x128xf32> -> vector<32x128xf32>
    %cst_14 = arith.constant dense<0.000000e+00> : vector<128xf32>
    %29 = vector.multi_reduction <add>, %28, %cst_14 [0] : vector<32x128xf32> to vector<128xf32>
    %30 = vector.shape_cast %29 : vector<128xf32> to vector<1x128xf32>
    %c64_i32 = arith.constant 64 : i32
    %31 = tpu.dynamic_rotate %30 by %c64_i32 dim 1 : vector<1x128xf32>, i32 -> vector<1x128xf32>
    %32 = arith.addf %30, %31 : vector<1x128xf32>
    %cst_15 = arith.constant 1.562500e-02 : f32
    %33 = vector.broadcast %cst_15 : f32 to vector<1x128xf32>
    %34 = arith.mulf %32, %33 : vector<1x128xf32>
    %35 = vector.broadcast %34 : vector<1x128xf32> to vector<32x128xf32>
    %36 = arith.subf %28, %35 : vector<32x128xf32>
    %37 = arith.mulf %36, %36 : vector<32x128xf32>
    %cst_16 = arith.constant dense<0.000000e+00> : vector<128xf32>
    %38 = vector.multi_reduction <add>, %37, %cst_16 [0] : vector<32x128xf32> to vector<128xf32>
    %39 = vector.shape_cast %38 : vector<128xf32> to vector<1x128xf32>
    %c64_i32_17 = arith.constant 64 : i32
    %40 = tpu.dynamic_rotate %39 by %c64_i32_17 dim 1 : vector<1x128xf32>, i32 -> vector<1x128xf32>
    %41 = arith.addf %39, %40 : vector<1x128xf32>
    %cst_18 = arith.constant 1.562500e-02 : f32
    %42 = vector.broadcast %cst_18 : f32 to vector<1x128xf32>
    %43 = arith.mulf %41, %42 : vector<1x128xf32>
    %c0_19 = arith.constant 0 : index
    %c0_20 = arith.constant 0 : index
    %44 = vector.load %arg4[%c0_19, %c0_20] : memref<1x128xf32, #tpu.memory_space<vmem>>, vector<1x128xf32>
    %cst_21 = arith.constant 9.99999974E-6 : f32
    %45 = vector.broadcast %cst_21 : f32 to vector<1x128xf32>
    %46 = arith.addf %43, %45 : vector<1x128xf32>
    %47 = math.rsqrt %46 : vector<1x128xf32>
    %48 = arith.mulf %44, %47 : vector<1x128xf32>
    %49 = vector.broadcast %48 : vector<1x128xf32> to vector<32x128xf32>
    %50 = arith.mulf %36, %49 : vector<32x128xf32>
    %c0_22 = arith.constant 0 : index
    %c0_23 = arith.constant 0 : index
    %51 = vector.load %arg5[%c0_22, %c0_23] : memref<1x128xf32, #tpu.memory_space<vmem>>, vector<1x128xf32>
    %52 = vector.broadcast %51 : vector<1x128xf32> to vector<32x128xf32>
    %53 = arith.addf %50, %52 : vector<32x128xf32>
    %cst_24 = arith.constant 0.000000e+00 : f32
    %54 = vector.broadcast %cst_24 : f32 to vector<32x128xf32>
    %55 = arith.cmpf oge, %53, %54 : vector<32x128xf32>
    %cst_25 = arith.constant 2.000000e-01 : f32
    %56 = vector.broadcast %cst_25 : f32 to vector<32x128xf32>
    %57 = arith.mulf %56, %53 : vector<32x128xf32>
    %58 = arith.select %55, %53, %57 : vector<32x128xi1>, vector<32x128xf32>
    %59 = vector.extract_strided_slice %58 {offsets = [0, 64], sizes = [32, 64], strides = [1, 1]} : vector<32x128xf32> to vector<32x64xf32>
    %60 = vector.extract_strided_slice %58 {offsets = [0, 0], sizes = [32, 64], strides = [1, 1]} : vector<32x128xf32> to vector<32x64xf32>
    %61 = vector.extract_strided_slice %59 {offsets = [31, 0], sizes = [1, 64], strides = [1, 1]} : vector<32x64xf32> to vector<1x64xf32>
    %62 = vector.extract_strided_slice %59 {offsets = [0, 0], sizes = [31, 64], strides = [1, 1]} : vector<32x64xf32> to vector<31x64xf32>
    %63 = tpu.concatenate %61, %62 in 0 : vector<1x64xf32>, vector<31x64xf32> -> vector<32x64xf32>
    %64 = vector.broadcast %0 : vector<32x1xf32> to vector<32x64xf32>
    %65 = arith.mulf %63, %64 : vector<32x64xf32>
    %66 = vector.extract_strided_slice %60 {offsets = [1, 0], sizes = [31, 64], strides = [1, 1]} : vector<32x64xf32> to vector<31x64xf32>
    %67 = vector.extract_strided_slice %60 {offsets = [0, 0], sizes = [1, 64], strides = [1, 1]} : vector<32x64xf32> to vector<1x64xf32>
    %68 = tpu.concatenate %66, %67 in 0 : vector<31x64xf32>, vector<1x64xf32> -> vector<32x64xf32>
    %69 = vector.broadcast %1 : vector<32x1xf32> to vector<32x64xf32>
    %70 = arith.mulf %68, %69 : vector<32x64xf32>
    %71 = tpu.concatenate %58, %65, %70 in 1 : vector<32x128xf32>, vector<32x64xf32>, vector<32x64xf32> -> vector<32x256xf32>
    %72 = arith.truncf %71 : vector<32x256xf32> to vector<32x256xbf16>
    %c0_26 = arith.constant 0 : index
    %c0_27 = arith.constant 0 : index
    %73 = vector.load %arg6[%c0_26, %c0_27] : memref<256x128xbf16, #tpu.memory_space<vmem>>, vector<256x128xbf16>
    %cst_28 = arith.constant dense<0.000000e+00> : vector<32x128xf32>
    %74 = tpu.matmul %72, %73, %cst_28 {dimension_numbers = #tpu.dot_dimension_numbers<[1], [0], [0], [1], [0, 0, 1, 1], [], []>} : vector<32x256xbf16>, vector<256x128xbf16>, vector<32x128xf32> -> vector<32x128xf32>
    %cst_29 = arith.constant dense<0.000000e+00> : vector<128xf32>
    %75 = vector.multi_reduction <add>, %74, %cst_29 [0] : vector<32x128xf32> to vector<128xf32>
    %76 = vector.shape_cast %75 : vector<128xf32> to vector<1x128xf32>
    %c64_i32_30 = arith.constant 64 : i32
    %77 = tpu.dynamic_rotate %76 by %c64_i32_30 dim 1 : vector<1x128xf32>, i32 -> vector<1x128xf32>
    %78 = arith.addf %76, %77 : vector<1x128xf32>
    %c32_i32 = arith.constant 32 : i32
    %79 = tpu.dynamic_rotate %78 by %c32_i32 dim 1 : vector<1x128xf32>, i32 -> vector<1x128xf32>
    %80 = arith.addf %78, %79 : vector<1x128xf32>
    %cst_31 = arith.constant 7.812500e-03 : f32
    %81 = vector.broadcast %cst_31 : f32 to vector<1x128xf32>
    %82 = arith.mulf %80, %81 : vector<1x128xf32>
    %83 = vector.broadcast %82 : vector<1x128xf32> to vector<32x128xf32>
    %84 = arith.subf %74, %83 : vector<32x128xf32>
    %85 = arith.mulf %84, %84 : vector<32x128xf32>
    %cst_32 = arith.constant dense<0.000000e+00> : vector<128xf32>
    %86 = vector.multi_reduction <add>, %85, %cst_32 [0] : vector<32x128xf32> to vector<128xf32>
    %87 = vector.shape_cast %86 : vector<128xf32> to vector<1x128xf32>
    %c64_i32_33 = arith.constant 64 : i32
    %88 = tpu.dynamic_rotate %87 by %c64_i32_33 dim 1 : vector<1x128xf32>, i32 -> vector<1x128xf32>
    %89 = arith.addf %87, %88 : vector<1x128xf32>
    %c32_i32_34 = arith.constant 32 : i32
    %90 = tpu.dynamic_rotate %89 by %c32_i32_34 dim 1 : vector<1x128xf32>, i32 -> vector<1x128xf32>
    %91 = arith.addf %89, %90 : vector<1x128xf32>
    %cst_35 = arith.constant 7.812500e-03 : f32
    %92 = vector.broadcast %cst_35 : f32 to vector<1x128xf32>
    %93 = arith.mulf %91, %92 : vector<1x128xf32>
    %c0_36 = arith.constant 0 : index
    %c0_37 = arith.constant 0 : index
    %94 = vector.load %arg7[%c0_36, %c0_37] : memref<1x128xf32, #tpu.memory_space<vmem>>, vector<1x128xf32>
    %cst_38 = arith.constant 9.99999974E-6 : f32
    %95 = vector.broadcast %cst_38 : f32 to vector<1x128xf32>
    %96 = arith.addf %93, %95 : vector<1x128xf32>
    %97 = math.rsqrt %96 : vector<1x128xf32>
    %98 = arith.mulf %94, %97 : vector<1x128xf32>
    %99 = vector.broadcast %98 : vector<1x128xf32> to vector<32x128xf32>
    %100 = arith.mulf %84, %99 : vector<32x128xf32>
    %c0_39 = arith.constant 0 : index
    %c0_40 = arith.constant 0 : index
    %101 = vector.load %arg8[%c0_39, %c0_40] : memref<1x128xf32, #tpu.memory_space<vmem>>, vector<1x128xf32>
    %102 = vector.broadcast %101 : vector<1x128xf32> to vector<32x128xf32>
    %103 = arith.addf %100, %102 : vector<32x128xf32>
    %cst_41 = arith.constant 0.000000e+00 : f32
    %104 = vector.broadcast %cst_41 : f32 to vector<32x128xf32>
    %105 = arith.cmpf oge, %103, %104 : vector<32x128xf32>
    %cst_42 = arith.constant 2.000000e-01 : f32
    %106 = vector.broadcast %cst_42 : f32 to vector<32x128xf32>
    %107 = arith.mulf %106, %103 : vector<32x128xf32>
    %108 = arith.select %105, %103, %107 : vector<32x128xi1>, vector<32x128xf32>
    %109 = vector.extract_strided_slice %108 {offsets = [0, 96], sizes = [32, 32], strides = [1, 1]} : vector<32x128xf32> to vector<32x32xf32>
    %110 = vector.extract_strided_slice %108 {offsets = [0, 0], sizes = [32, 32], strides = [1, 1]} : vector<32x128xf32> to vector<32x32xf32>
    %111 = vector.extract_strided_slice %109 {offsets = [31, 0], sizes = [1, 32], strides = [1, 1]} : vector<32x32xf32> to vector<1x32xf32>
    %112 = vector.extract_strided_slice %109 {offsets = [0, 0], sizes = [31, 32], strides = [1, 1]} : vector<32x32xf32> to vector<31x32xf32>
    %113 = tpu.concatenate %111, %112 in 0 : vector<1x32xf32>, vector<31x32xf32> -> vector<32x32xf32>
    %114 = vector.broadcast %0 : vector<32x1xf32> to vector<32x32xf32>
    %115 = arith.mulf %113, %114 : vector<32x32xf32>
    %116 = vector.extract_strided_slice %110 {offsets = [1, 0], sizes = [31, 32], strides = [1, 1]} : vector<32x32xf32> to vector<31x32xf32>
    %117 = vector.extract_strided_slice %110 {offsets = [0, 0], sizes = [1, 32], strides = [1, 1]} : vector<32x32xf32> to vector<1x32xf32>
    %118 = tpu.concatenate %116, %117 in 0 : vector<31x32xf32>, vector<1x32xf32> -> vector<32x32xf32>
    %119 = vector.broadcast %1 : vector<32x1xf32> to vector<32x32xf32>
    %120 = arith.mulf %118, %119 : vector<32x32xf32>
    %121 = tpu.concatenate %108, %115, %120 in 1 : vector<32x128xf32>, vector<32x32xf32>, vector<32x32xf32> -> vector<32x192xf32>
    %122 = arith.truncf %121 : vector<32x192xf32> to vector<32x192xbf16>
    %c0_43 = arith.constant 0 : index
    %c0_44 = arith.constant 0 : index
    %123 = vector.load %arg9[%c0_43, %c0_44] : memref<192x8xbf16, #tpu.memory_space<vmem>>, vector<192x8xbf16>
    %cst_45 = arith.constant dense<0.000000e+00> : vector<32x8xf32>
    %124 = tpu.matmul %122, %123, %cst_45 {dimension_numbers = #tpu.dot_dimension_numbers<[1], [0], [0], [1], [0, 0, 1, 1], [], []>} : vector<32x192xbf16>, vector<192x8xbf16>, vector<32x8xf32> -> vector<32x8xf32>
    %c0_46 = arith.constant 0 : index
    %c0_47 = arith.constant 0 : index
    %125 = vector.load %arg10[%c0_46, %c0_47] : memref<1x1xf32, #tpu.memory_space<vmem>>, vector<1x1xf32>
    %126 = vector.broadcast %125 : vector<1x1xf32> to vector<32x8xf32>
    %127 = arith.addf %124, %126 : vector<32x8xf32>
    %c0_48 = arith.constant 0 : index
    %c0_49 = arith.constant 0 : index
    %128 = vector.load %arg13[%c0_48, %c0_49] : memref<32x8xf32, #tpu.memory_space<vmem>>, vector<32x8xf32>
    tpu.vector_store %arg13[%c0_48, %c0_49], %127 {strides = array<i32>} : memref<32x8xf32, #tpu.memory_space<vmem>>, vector<32x8xf32>,
    return
  }
}

</mosaic_0001>

<bundles_post_ra>
// kernel: tpu_custom_call.1
= control target key start
LH: loop header
LB: loop body
LE: loop exit
PB: predicated region body
PF: predicated region fallthrough
CT: control target
= control target key end

     0   :  { %s2251_s0 = inlined_call_operand.vmem [shape: bf16[4,8], index: 0, kind: input, shape index: {}]   ;;  %s2252_s1 = inlined_call_operand.vmem [shape: bf16[8,1024], index: 1, kind: input, shape index: {}]   ;;  %s2253_s2 = inlined_call_operand.vmem [shape: f32[1,1024], index: 2, kind: input, shape index: {}]   ;;  %s2254_s3 = inlined_call_operand.hbm [shape: bf16[384,128], index: 3, kind: input, shape index: {}]   ;;  %s2255_s4 = inlined_call_operand.vmem [shape: f32[1,128], index: 4, kind: input, shape index: {}]   ;;  %s2256_s5 = inlined_call_operand.vmem [shape: f32[1,128], index: 5, kind: input, shape index: {}]   ;;  %s2257_s6 = inlined_call_operand.vmem [shape: bf16[256,128], index: 6, kind: input, shape index: {}]   ;;  %s2258_s7 = inlined_call_operand.vmem [shape: f32[1,128], index: 7, kind: input, shape index: {}]   ;;  %s2259_s8 = inlined_call_operand.vmem [shape: f32[1,128], index: 8, kind: input, shape index: {}]   ;;  %s2260_s9 = inlined_call_operand.vmem [shape: bf16[192,8], index: 9, kind: input, shape index: {}]   ;;  %s2261_s10 = inlined_call_operand.<no memory space> [shape: f32[1,1], index: 10, kind: input, shape index: {}]   ;;  %s2262_s11 = inlined_call_operand.vmem [shape: f32[32,1], index: 11, kind: input, shape index: {}]   ;;  %s2263_s12 = inlined_call_operand.vmem [shape: f32[32,1], index: 12, kind: input, shape index: {}]   ;;  %s2264_s13 = inlined_call_operand.vmem [shape: f32[32,8], index: 13, kind: output, shape index: {}]  }
   0x1   :  { %v18_v0 = vstv %s2261_s10 }
   0x2   :  { %19 = vst [vmem:[#allocation2] sm:$0x1] %v18_v0 }
   0x3   :  { %20 = vsyncpa [#allocation4], 0  ;;  %s1833_s27 = smov [#allocation3]   ;;  %s1809_s14 = scalar_lea.hbm %s2254_s3, 3072 }
   0x4   :  { %s32_s28 = sshll.u32 %s1833_s27, 4  ;;  %p1810_p0 = scmp.ne.s32.totalorder %s2254_s3, %s1809_s14  ;;  %s33_s28 = int_to_ptr.vmem [resolvable:$true] %s32_s28 }
   0x5   :  { %p1813_p1 = scmp.lt.u32.totalorder %s1809_s14, %s2254_s3 }
   0x7   :  { %p1815_p2 = pnand %p1813_p1, %p1810_p0 }
   0x9   :  { %1818 = shalt.err (!%p1815_p2)
}
   0xa   :  { %s1819_s10 = scalar_lea.vmem %s33_s28, 3072  ;;  %p1824_p4 = scmp.lt.s32.totalorder %s33_s28, %s33_s28 }
   0xb   :  { %p1820_p3 = scmp.ne.s32.totalorder %s33_s28, %s1819_s10  ;;  %p1825_p5 = scmp.lt.s32.totalorder %s1819_s10, %s1819_s10 }
   0xd   :  { %p1826_p6 = por %p1825_p5, %p1824_p4 }
   0xf   :  { %p1827_p7 = pnand %p1826_p6, %p1820_p3 }
  0x11   :  { %1830 = shalt.err (!%p1827_p7)
}
  0x12   :  { %s1834_s19 = smov 64   ;;  %s1835_s20 = smov 4  }
  0x13   :  { %38 = dma.hbm_to_vmem [thread:$0]  %s2254_s3, 3072, %s33_s28, [#allocation4], %s1834_s19, %s1834_s19, %s1835_s20  }
  0x14   :  { %1831 = dma.done.wait [#allocation4], 3072  }
  0x15   :  { %1832 = vsyncadd [#allocation4], 4294964224  ;;  %v1836_v1 = vmov 0   ;;  %v70_v2 = vld [vmem:[%s2252_s1] sm:$0xff]  ;;  %vm140_vm0 = vcmask 1043456   ;;  %v71_v3 = vld [vmem:[%s2252_s1 + $0x8] sm:$0xff]  ;;  %v76_v51 = vlaneseq }
  0x16   :  { %197 = vmatprep.mubr.bf16.mxu0 %v1836_v1  ;;  %320 = vmatprep.mubr.bf16.mxu1 %v1836_v1  ;;  %v1537_v4 = vcombine.high %v70_v2, %v70_v2  ;;  %v1536_v5 = vcombine.low %v70_v2, %v70_v2  ;;  %v1539_v6 = vcombine.high %v71_v3, %v71_v3  ;;  %v72_v8 = vld [vmem:[%s2252_s1 + $0x10] sm:$0xff]  ;;  %v73_v9 = vld [vmem:[%s2252_s1 + $0x18] sm:$0xff]  ;;  %v65_v10 = vld [vmem:[%s2263_s12] sm:$0xff]  ;;  %vm136_vm1 = vcmask 64512  }
  0x17   :  { %1704 = vset.pattern.permute.xlu1 %v1836_v1  ;;  %1703 = vset.pattern.permute.xlu0 %v1836_v1  ;;  %v1538_v7 = vcombine.low %v71_v3, %v71_v3  ;;  %v1540_v11 = vcombine.low %v72_v8, %v72_v8  ;;  %v1543_v12 = vcombine.high %v73_v9, %v73_v9  ;;  %v61_v14 = vld [vmem:[%s2262_s11] sm:$0xff]  ;;  %v66_v17 = vld [vmem:[%s2263_s12 + $0x8] sm:$0xff]  ;;  %v68_v23 = vld [vmem:[%s2263_s12 + $0x18] sm:$0xff]  ;;  %v1986_v52 = vshrl.u32 %v76_v51, 7 }
  0x18   :  { %v1542_v13 = vcombine.low %v73_v9, %v73_v9  ;;  %557 = vperm.xlu1 %1704, %v65_v10   ;;  %1544 = vmatprep.subr.msk.bf16.mxu0 %vm140_vm0, %v1537_v4  ;;  %v142_v15 = vsel %vm140_vm0, %v1536_v5, 0  ;;  %v69_v16 = vld [vmem:[%s2251_s0] sm:$0x3]  ;;  %v62_v21 = vld [vmem:[%s2262_s11 + $0x8] sm:$0xff]  ;;  %v1541_v22 = vcombine.high %v72_v8, %v72_v8  ;;  %v67_v24 = vld [vmem:[%s2263_s12 + $0x10] sm:$0xff]  ;;  %vm539_vm10 = vcmask 1046528  }
  0x19   :  { %517 = vperm.xlu0 %1703, %v61_v14   ;;  %166 = vmatpush1.bf16.msra.mxu0 %v142_v15  ;;  %v148_v18 = vsel %vm140_vm0, %v1538_v7, 0  ;;  %v154_v19 = vsel %vm140_vm0, %v1540_v11, 0  ;;  %v64_v25 = vld [vmem:[%s2262_s11 + $0x18] sm:$0xff]  ;;  %v63_v26 = vld [vmem:[%s2262_s11 + $0x10] sm:$0xff]  ;;  %v1753_v27 = vld [vmem:[#allocation3 + $0x40] sm:$0xff]   ;;  %v1989_v53 = vsub.s32 0, %v1986_v52 }
  0x1a   :  { %1550 = vmatprep.subr.msk.bf16.mxu1 %vm140_vm0, %v1543_v12  ;;  %v160_v20 = vsel %vm140_vm0, %v1542_v13, 0  ;;  %1546 = vmatprep.subr.msk.bf16.mxu0 %vm140_vm0, %v1539_v6  ;;  %v1754_v28 = vld [vmem:[#allocation3 + $0x80] sm:$0xff]   ;;  %v1756_v30 = vld [vmem:[#allocation3 + $0x48] sm:$0xff]   ;;  %v1759_v33 = vld [vmem:[#allocation3 + $0x50] sm:$0xff]   ;;  %v82_v55 = vsub.s32 1, %v1986_v52  ;;  %v102_v56 = vsub.s32 6, %v1986_v52 }
  0x1b   :  { %289 = vmatpush1.bf16.msra.mxu1 %v160_v20  ;;  %v1755_v29 = vld [vmem:[#allocation3] sm:$0xff]   ;;  %v1757_v31 = vld [vmem:[#allocation3 + $0x88] sm:$0xff]   ;;  %v1760_v34 = vld [vmem:[#allocation3 + $0x90] sm:$0xff]   ;;  %v106_v57 = vsub.s32 7, %v1986_v52  ;;  %v86_v2 = vsub.s32 2, %v1986_v52  ;;  %v90_v5 = vsub.s32 3, %v1986_v52 }
  0x1c   :  { %562 = vperm.xlu1 %1704, %v66_v17   ;;  %1545 = vmatmul.mubr.msk.bf16.vlgmr.msra.gmra.mrb[0].mxu0 %vm136_vm1, %v69_v16  ;;  %v1758_v32 = vld [vmem:[#allocation3 + $0x8] sm:$0xff]   ;;  %v1761_v35 = vld [vmem:[#allocation3 + $0x10] sm:$0xff]   ;;  %v1762_v36 = vld [vmem:[#allocation3 + $0x58] sm:$0xff]   ;;  %v1837_v8 = vmov 1966171168   ;;  %vm502_vm11 = vcmask 1040384  }
  0x1d   :  { %522 = vperm.xlu0 %1703, %v62_v21   ;;  %207 = vmatpush1.bf16.msra.mxu0 %v148_v18  ;;  %v1763_v37 = vld [vmem:[#allocation3 + $0x98] sm:$0xff]   ;;  %v1765_v39 = vld [vmem:[#allocation3 + $0x60] sm:$0xff]   ;;  %v1768_v42 = vld [vmem:[#allocation3 + $0x68] sm:$0xff]   ;;  %v432_v9 = vunpack.c.l.s4 %v1837_v8  ;;  %v1838_v14 = vmov 1983009808  }
  0x1e   :  { %238 = vmatprep.mubr.bf16.mxu0 %v1836_v1  ;;  %1548 = vmatprep.subr.msk.bf16.mxu0 %vm140_vm0, %v1541_v22  ;;  %v1764_v38 = vld [vmem:[#allocation3 + $0x18] sm:$0xff]   ;;  %v1766_v40 = vld [vmem:[#allocation3 + $0xa0] sm:$0xff]   ;;  %v1769_v43 = vld [vmem:[#allocation3 + $0xa8] sm:$0xff]   ;;  %v355_v15 = vunpack.c.l.s4 %v1838_v14  ;;  %vm1020_vm0 = vcmask 523264  }
  0x1f   :  { %1551 = vmatmul.mubr.msk.bf16.vlgmr.msra.gmra.mrb[0].mxu1 %vm136_vm1, %v69_v16  ;;  %1675 = vmatprep.subr.bf16.mxu1 %v1754_v28  ;;  %v1767_v41 = vld [vmem:[#allocation3 + $0x20] sm:$0xff]   ;;  %v1770_v44 = vld [vmem:[#allocation3 + $0x28] sm:$0xff]   ;;  %v1771_v45 = vld [vmem:[#allocation3 + $0x70] sm:$0xff]  }
  0x20   :  { %572 = vperm.xlu1 %1704, %v68_v23   ;;  %1676 = vmatpush3.bf16.msra.mxu1 %v1754_v28  ;;  %v1772_v46 = vld [vmem:[#allocation3 + $0xb0] sm:$0xff]   ;;  %v1774_v48 = vld [vmem:[#allocation3 + $0x78] sm:$0xff]   ;;  %v356_v28 = vunpack.c.0.s8 %v355_v15 }
  0x21   :  { %567 = vperm.xlu0 %1703, %v67_v24   ;;  %1677 = vmatprep.subr.bf16.mxu1 %v1757_v31  ;;  %v1773_v47 = vld [vmem:[#allocation3 + $0x30] sm:$0xff]   ;;  %v1775_v49 = vld [vmem:[#allocation3 + $0xb8] sm:$0xff]  }
  0x22   :  { %v1776_v50 = vld [vmem:[#allocation3 + $0x38] sm:$0xff]  }
  0x23   :  { %v1994_v54 = vld [vmem:[%s2253_s2] sm:$0xff] }
  0x24   :  { %532 = vperm.xlu1 %1704, %v64_v25   ;;  %1547 = vmatmul.mubr.msk.bf16.vlgmr.msra.gmra.mrb[4].mxu0 %vm136_vm1, %v69_v16  ;;  %v79_v58 = vrot.slane %v1994_v54, %v1989_v53  ;;  %v83_v59 = vrot.slane %v1994_v54, %v82_v55  ;;  %v103_v60 = vrot.slane %v1994_v54, %v102_v56 }
  0x25   :  { %527 = vperm.xlu0 %1703, %v63_v26   ;;  %248 = vmatpush1.bf16.msra.mxu0 %v154_v19  ;;  %v107_v62 = vrot.slane %v1994_v54, %v106_v57  ;;  %v87_v19 = vrot.slane %v1994_v54, %v86_v2  ;;  %v91_v23 = vrot.slane %v1994_v54, %v90_v5 }
  0x26   :  { %279 = vmatprep.mubr.bf16.mxu0 %v1836_v1  ;;  %1609 = vmatprep.subr.bf16.mxu0 %v1753_v27 }
  0x27   :  { %1678 = vmatpush3.bf16.msra.mxu1 %v1757_v31 }
  0x28   :  { %1679 = vmatprep.subr.bf16.mxu1 %v1760_v34 }
  0x2b   :  { %1680 = vmatpush3.bf16.msra.mxu1 %v1760_v34  ;;  %v94_v34 = vsub.s32 4, %v1986_v52 }
  0x2c   :  { %1549 = vmatmul.mubr.msk.bf16.vlgmr.msra.gmra.mrb[8].mxu0 %vm136_vm1, %v69_v16  ;;  %1681 = vmatprep.subr.bf16.mxu1 %v1763_v37 }
  0x2d   :  { %1610 = vmatpush3.bf16.msra.mxu0 %v1755_v29 }
  0x2e   :  { %1611 = vmatprep.subr.bf16.mxu0 %v1756_v30  ;;  %v433_v30 = vunpack.c.0.s8 %v432_v9 }
  0x2f   :  { %1682 = vmatpush3.bf16.msra.mxu1 %v1763_v37  ;;  %v98_v37 = vsub.s32 5, %v1986_v52 }
  0x30   :  { %1683 = vmatprep.subr.bf16.mxu1 %v1766_v40 }
  0x31   :  { %1612 = vmatpush3.bf16.msra.mxu0 %v1758_v32 }
  0x32   :  { %1613 = vmatprep.subr.bf16.mxu0 %v1759_v33 }
  0x33   :  { %1684 = vmatpush3.bf16.msra.mxu1 %v1766_v40  ;;  %v359_v40 = vsub.s32 %v356_v28, %v1986_v52 }
  0x34   :  { %1685 = vmatprep.subr.bf16.mxu1 %v1769_v43 }
  0x35   :  { %1614 = vmatpush3.bf16.msra.mxu0 %v1761_v35 }
  0x36   :  { %1615 = vmatprep.subr.bf16.mxu0 %v1762_v36 }
  0x37   :  { %1686 = vmatpush3.bf16.msra.mxu1 %v1769_v43 }
  0x38   :  { %1687 = vmatprep.subr.bf16.mxu1 %v1772_v46 }
  0x39   :  { %1616 = vmatpush3.bf16.msra.mxu0 %v1764_v38 }
  0x3a   :  { %1617 = vmatprep.subr.bf16.mxu0 %v1765_v39 }
  0x3b   :  { %1688 = vmatpush3.bf16.msra.mxu1 %v1772_v46 }
  0x3c   :  { %1689 = vmatprep.subr.bf16.mxu1 %v1775_v49 }
  0x3d   :  { %1618 = vmatpush3.bf16.msra.mxu0 %v1767_v41 }
  0x3e   :  { %1619 = vmatprep.subr.bf16.mxu0 %v1768_v42  ;;  %v436_v42 = vsub.s32 %v433_v30, %v1986_v52 }
  0x3f   :  { %1690 = vmatpush3.bf16.msra.mxu1 %v1775_v49 }
  0x40   :  { %1478 = vmatprep.subr.bf16.mxu1 %v1836_v1 }
  0x41   :  { %1620 = vmatpush3.bf16.msra.mxu0 %v1770_v44  ;;  %v95_v44 = vrot.slane %v1994_v54, %v94_v34 }
  0x42   :  { %1621 = vmatprep.subr.bf16.mxu0 %v1771_v45 }
  0x45   :  { %1622 = vmatpush3.bf16.msra.mxu0 %v1773_v47  ;;  %v99_v47 = vrot.slane %v1994_v54, %v98_v37 }
  0x46   :  { %1623 = vmatprep.subr.bf16.mxu0 %v1774_v48  ;;  %v1839_v48 = vmov 1934713408  }
  0x47   :  { %v388_v49 = vunpack.c.l.s4 %v1839_v48 }
  0x49   :  { %1624 = vmatpush3.bf16.msra.mxu0 %v1776_v50 }
  0x97   :  { %v2014_v8 = vpop.permute.xlu1 %557 }
  0x98   :  { %v2016_v9 = vpop.permute.xlu0 %517 }
  0xef   :  { %v199_v61 = vpop.f32.mrb[0].mxu0 }
  0xf0   :  { %v200_v63 = vadd.f32 %v199_v61, %v79_v58  ;;  %v201_v0 = vpop.f32.mrb[1].mxu0 }
  0xf1   :  { %v202_v3 = vadd.f32 %v201_v0, %v83_v59  ;;  %v203_v4 = vpop.f32.mrb[2].mxu0  ;;  %v389_v0 = vunpack.c.0.s8 %v388_v49 }
  0xf2   :  { %v322_v6 = vpop.f32.mrb[0].mxu1  ;;  %vm329_vm2 = vcmp.ge.f32.partialorder %v200_v63, 0.0  ;;  %v337_v7 = vmul.f32 0.2, %v200_v63  ;;  %v204_v10 = vpop.f32.mrb[3].mxu0 }
  0xf3   :  { %v323_v11 = vadd.f32 %v322_v6, %v103_v60  ;;  %v324_v12 = vpop.f32.mrb[1].mxu1  ;;  %vm330_vm3 = vcmp.ge.f32.partialorder %v202_v3, 0.0  ;;  %v338_v13 = vmul.f32 0.2, %v202_v3  ;;  %v392_v15 = vsub.s32 %v389_v0, %v1986_v52 }
  0xf4   :  { %v325_v16 = vadd.f32 %v324_v12, %v107_v62  ;;  %v326_v17 = vpop.f32.mrb[2].mxu1  ;;  %v345_v18 = vsel %vm329_vm2, %v200_v63, %v337_v7 }
  0xf5   :  { %vm335_vm4 = vcmp.ge.f32.partialorder %v323_v11, 0.0  ;;  %v343_v20 = vmul.f32 0.2, %v323_v11  ;;  %v327_v21 = vpop.f32.mrb[3].mxu1  ;;  %v346_v22 = vsel %vm330_vm3, %v202_v3, %v338_v13 }
  0xf6   :  { %vm336_vm5 = vcmp.ge.f32.partialorder %v325_v16, 0.0  ;;  %v344_v24 = vmul.f32 0.2, %v325_v16  ;;  %v427_v25 = vcombine.low %v345_v18, %v346_v22  ;;  %v2021_v21 = vpop.permute.xlu0 %522 }
  0xf7   :  { %v351_v26 = vsel %vm335_vm4, %v323_v11, %v343_v20  ;;  %v240_v27 = vpop.f32.mrb[4].mxu0  ;;  %v2019_v20 = vpop.permute.xlu1 %562 }
  0xf8   :  { %v352_v29 = vsel %vm336_vm5, %v325_v16, %v344_v24  ;;  %v241_v31 = vadd.f32 %v240_v27, %v87_v19  ;;  %v242_v32 = vpop.f32.mrb[5].mxu0  ;;  %v437_v57 = vrot.slane %v427_v25, %v436_v42 }
  0xf9   :  { %v430_v33 = vcombine.low %v351_v26, %v352_v29  ;;  %v243_v35 = vadd.f32 %v242_v32, %v91_v23  ;;  %v244_v36 = vpop.f32.mrb[6].mxu0 }
  0xfa   :  { %vm331_vm6 = vcmp.ge.f32.partialorder %v241_v31, 0.0  ;;  %v339_v38 = vmul.f32 0.2, %v241_v31  ;;  %v245_v39 = vpop.f32.mrb[7].mxu0 }
  0xfb   :  { %vm332_vm7 = vcmp.ge.f32.partialorder %v243_v35, 0.0  ;;  %v340_v41 = vmul.f32 0.2, %v243_v35  ;;  %v458_v16 = vrot.slane %v430_v33, %v436_v42  ;;  %v2023_v39 = vpop.permute.xlu1 %572 }
  0xfc   :  { %v347_v43 = vsel %vm331_vm6, %v241_v31, %v339_v38  ;;  %vm1357_vm6 = vcmask 261120  }
  0xfd   :  { %v353_v45 = vcombine.low %v345_v18, %v347_v43  ;;  %v348_v46 = vsel %vm332_vm7, %v243_v35, %v340_v41 }
  0xfe   :  { %v361_v50 = vcombine.low %v346_v22, %v348_v46  ;;  %v428_v51 = vcombine.low %v347_v43, %v348_v46 }
  0xff   :  { %v360_v55 = vrot.slane %v353_v45, %v359_v40  ;;  %v281_v56 = vpop.f32.mrb[8].mxu0 }
 0x100   :  { %v368_v58 = vrot.slane %v361_v50, %v359_v40  ;;  %v444_v59 = vrot.slane %v428_v51, %v436_v42  ;;  %v282_v60 = vadd.f32 %v281_v56, %v95_v44  ;;  %v283_v61 = vpop.f32.mrb[9].mxu0 }
 0x101   :  { %v284_v62 = vadd.f32 %v283_v61, %v99_v47  ;;  %v285_v63 = vpop.f32.mrb[10].mxu0 }
 0x102   :  { %v385_v2 = vcombine.low %v360_v55, %v368_v58  ;;  %v386_v3 = vcombine.high %v360_v55, %v368_v58  ;;  %v459_v4 = vcombine.low %v437_v57, %v444_v59  ;;  %v460_v5 = vcombine.high %v437_v57, %v444_v59  ;;  %v286_v6 = vpop.f32.mrb[11].mxu0 }
 0x103   :  { %vm333_vm8 = vcmp.ge.f32.partialorder %v282_v60, 0.0  ;;  %v341_v54 = vmul.f32 0.2, %v282_v60  ;;  %vm334_vm9 = vcmp.ge.f32.partialorder %v284_v62, 0.0  ;;  %v342_v7 = vmul.f32 0.2, %v284_v62 }
 0x104   :  { %v469_v27 = vrot.slane %v459_v4, %v436_v42  ;;  %v476_v28 = vrot.slane %v460_v5, %v436_v42  ;;  %v400_v30 = vrot.slane %v386_v3, %v392_v15  ;;  %v393_v52 = vrot.slane %v385_v2, %v392_v15  ;;  %v2040_v4 = vpop.permute.xlu1 %532 }
 0x105   :  { %v349_v10 = vsel %vm333_vm8, %v282_v60, %v341_v54  ;;  %v350_v11 = vsel %vm334_vm9, %v284_v62, %v342_v7 }
 0x106   :  { %v369_v12 = vcombine.low %v349_v10, %v351_v26  ;;  %v377_v13 = vcombine.low %v350_v11, %v352_v29  ;;  %v429_v14 = vcombine.low %v349_v10, %v350_v11 }
 0x108   :  { %v376_v17 = vrot.slane %v369_v12, %v359_v40  ;;  %v384_v18 = vrot.slane %v377_v13, %v359_v40  ;;  %v451_v19 = vrot.slane %v429_v14, %v436_v42  ;;  %v2025_v40 = vpop.permute.xlu0 %567 }
 0x10a   :  { %v401_v22 = vcombine.low %v376_v17, %v384_v18  ;;  %v402_v23 = vcombine.high %v376_v17, %v384_v18  ;;  %v461_v24 = vcombine.low %v451_v19, %v458_v16  ;;  %v462_v25 = vcombine.high %v451_v19, %v458_v16 }
 0x10c   :  { %v483_v26 = vrot.slane %v461_v24, %v436_v42  ;;  %v490_v29 = vrot.slane %v462_v25, %v436_v42  ;;  %v416_v31 = vrot.slane %v402_v23, %v392_v15  ;;  %v409_v32 = vrot.slane %v401_v22, %v392_v15  ;;  %v2043_v6 = vpop.permute.xlu0 %527 }
 0x10e   :  { %v491_v33 = vcombine.low %v469_v27, %v483_v26  ;;  %v493_v34 = vcombine.low %v476_v28, %v490_v29  ;;  %v418_v35 = vcombine.high %v400_v30, %v416_v31  ;;  %v492_v36 = vcombine.high %v469_v27, %v483_v26 }
 0x10f   :  { %v417_v37 = vcombine.low %v393_v52, %v409_v32  ;;  %v494_v38 = vcombine.high %v476_v28, %v490_v29 }
 0x110   :  { %v540_v41 = vrot.slane %v491_v33, 1  ;;  %v541_v43 = vrot.slane %v493_v34, 1  ;;  %v500_v44 = vrot.slane %v418_v35, 7  ;;  %v503_v45 = vrot.slane %v491_v33, 7 }
 0x111   :  { %v543_v42 = vrot.slane %v492_v36, 1  ;;  %v504_v46 = vrot.slane %v493_v34, 7  ;;  %v545_v47 = vrot.slane %v494_v38, 1  ;;  %v552_v48 = vrot.slane %v417_v37, 1 }
 0x112   :  { %v542_v49 = vsel %vm539_vm10, %v540_v41, %v541_v43  ;;  %v514_v50 = vsel %vm502_vm11, %v500_v44, %v503_v45  ;;  %v506_v51 = vrot.slane %v492_v36, 7  ;;  %v508_v55 = vrot.slane %v494_v38, 7 }
 0x113   :  { %v575_v56 = vmul.f32 %v2014_v8, %v542_v49  ;;  %v535_v57 = vmul.f32 %v2016_v9, %v514_v50  ;;  %v544_v58 = vsel %vm539_vm10, %v541_v43, %v543_v42  ;;  %v505_v59 = vsel %vm502_vm11, %v503_v45, %v504_v46 }
 0x114   :  { %v576_v60 = vmul.f32 %v2019_v20, %v544_v58  ;;  %v536_v61 = vmul.f32 %v2021_v21, %v505_v59  ;;  %v554_v62 = vsel %vm539_vm10, %v545_v47, %v552_v48  ;;  %v546_v63 = vsel %vm539_vm10, %v543_v42, %v545_v47 }
 0x115   :  { %v578_v0 = vmul.f32 %v2023_v39, %v554_v62  ;;  %v577_v2 = vmul.f32 %v2025_v40, %v546_v63  ;;  %v509_v3 = vsel %vm502_vm11, %v506_v51, %v508_v55  ;;  %v507_v5 = vsel %vm502_vm11, %v504_v46, %v506_v51 }
 0x116   :  { %v538_v54 = vmul.f32 %v2040_v4, %v509_v3  ;;  %v537_v7 = vmul.f32 %v2043_v6, %v507_v5  ;;  %v580_v10 = vpack.c.bf16 %v536_v61, %v535_v57  ;;  %v581_v11 = vpack.c.bf16 %v576_v60, %v575_v56 }
 0x117   :  { %v584_v12 = vpack.c.bf16 %v578_v0, %v577_v2  ;;  %v579_v13 = vpack.c.bf16 %v493_v34, %v491_v33  ;;  %v582_v14 = vpack.c.bf16 %v494_v38, %v492_v36 }
 0x118   :  { %809 = vmatprep.mubr.bf16.mxu0 %v580_v10  ;;  %1691 = vmatprep.mubr.bf16.mxu1 %v581_v11  ;;  %v583_v15 = vpack.c.bf16 %v538_v54, %v537_v7 }
 0x119   :  { %810 = vmatmul.mubr.bf16.vlgmr.msra.gmra.mrb[12].mxu0 %v579_v13  ;;  %1692 = vmatmul.mubr.bf16.vlgmr.msra.gmra.mrb[4].mxu1 %v584_v12  ;;  %v1777_v12 = vld [vmem:[%s2257_s6 + $0x40] sm:$0xff]  }
 0x11a   :  { %817 = vmatprep.mubr.bf16.mxu0 %v583_v15  ;;  %v1778_v13 = vld [vmem:[%s2257_s6] sm:$0xff]   ;;  %1647 = vmatprep.subr.bf16.mxu0 %v1777_v12  ;;  %v1780_v15 = vld [vmem:[%s2257_s6 + $0x8] sm:$0xff]  }
 0x11b   :  { %1648 = vmatpush3.bf16.msra.mxu0 %v1778_v13 }
 0x121   :  { %818 = vmatmul.mubr.bf16.gmra.mrb[16].mxu0 %v582_v14  ;;  %v1779_v14 = vld [vmem:[%s2257_s6 + $0x48] sm:$0xff]  }
 0x122   :  { %1649 = vmatprep.subr.bf16.mxu0 %v1779_v14 }
 0x123   :  { %1650 = vmatpush3.bf16.msra.mxu0 %v1780_v15 }
 0x1ec   :  { %v1625_v16 = vpop.f32.mrb[12].mxu0  ;;  %v1693_v17 = vpop.f32.mrb[4].mxu1 }
 0x1ed   :  { %v1626_v18 = vpop.f32.mrb[13].mxu0  ;;  %v860_v19 = vpop.f32.mrb[5].mxu1 }
 0x1ee   :  { %v1627_v22 = vadd.f32 %v1626_v18, %v1625_v16  ;;  %v1628_v23 = vpop.f32.mrb[14].mxu0  ;;  %v1694_v24 = vpop.f32.mrb[6].mxu1  ;;  %v1781_v16 = vld [vmem:[%s2257_s6 + $0x50] sm:$0xff]   ;;  %v1783_v18 = vld [vmem:[%s2257_s6 + $0x58] sm:$0xff]  }
 0x1ef   :  { %v1629_v25 = vpop.f32.mrb[15].mxu0  ;;  %v863_v27 = vpop.f32.mrb[7].mxu1  ;;  %1651 = vmatprep.subr.bf16.mxu0 %v1781_v16 }
 0x1f0   :  { %v861_v28 = vadd.f32 %v1627_v22, %v860_v19  ;;  %v1630_v30 = vadd.f32 %v1629_v25, %v1628_v23  ;;  %v1784_v19 = vld [vmem:[%s2257_s6 + $0x18] sm:$0xff]   ;;  %v1785_v22 = vld [vmem:[%s2257_s6 + $0x60] sm:$0xff]   ;;  %v1788_v25 = vld [vmem:[%s2257_s6 + $0x28] sm:$0xff]  }
 0x1f1   :  { %v1786_v23 = vld [vmem:[%s2257_s6 + $0x20] sm:$0xff]  }
 0x1f2   :  { %v864_v26 = vadd.f32 %v1630_v30, %v863_v27  ;;  %v1789_v27 = vld [vmem:[%s2257_s6 + $0x70] sm:$0xff]  }
 0x1f4   :  { %v1631_v29 = vpop.f32.mrb[16].mxu0  ;;  %v875_v34 = vadd.f32 %v864_v26, %v861_v28 }
 0x1f5   :  { %v1632_v31 = vpop.f32.mrb[17].mxu0 }
 0x1f6   :  { %v1633_v32 = vadd.f32 %v1632_v31, %v1631_v29  ;;  %v1634_v52 = vpop.f32.mrb[18].mxu0 }
 0x1f7   :  { %v1635_v33 = vpop.f32.mrb[19].mxu0 }
 0x1f8   :  { %v869_v35 = vadd.f32 %v1693_v17, %v1633_v32  ;;  %v1636_v36 = vadd.f32 %v1635_v33, %v1634_v52  ;;  %v1782_v17 = vld [vmem:[%s2257_s6 + $0x10] sm:$0xff]   ;;  %v913_v32 = vld [vmem:[%s2255_s4] sm:$0x1] }
 0x1f9   :  { %1652 = vmatpush3.bf16.msra.mxu0 %v1782_v17 }
 0x1fa   :  { %v876_v37 = vadd.f32 %v875_v34, %v869_v35  ;;  %v872_v38 = vadd.f32 %v1694_v24, %v1636_v36  ;;  %1653 = vmatprep.subr.bf16.mxu0 %v1783_v18  ;;  %v1787_v24 = vld [vmem:[%s2257_s6 + $0x68] sm:$0xff]  }
 0x1fc   :  { %v877_v41 = vadd.f32 %v876_v37, %v872_v38 }
 0x1fd   :  { %1654 = vmatpush3.bf16.msra.mxu0 %v1784_v19 }
 0x1fe   :  { %v878_v43 = vrot.slane %v877_v41, 4  ;;  %1655 = vmatprep.subr.bf16.mxu0 %v1785_v22 }
 0x200   :  { %v879_v44 = vadd.f32 %v878_v43, %v877_v41 }
 0x201   :  { %1656 = vmatpush3.bf16.msra.mxu0 %v1786_v23 }
 0x202   :  { %v880_v45 = vrot.slane %v879_v44, 2  ;;  %1657 = vmatprep.subr.bf16.mxu0 %v1787_v24 }
 0x204   :  { %v881_v42 = vadd.f32 %v880_v45, %v879_v44 }
 0x205   :  { %1658 = vmatpush3.bf16.msra.mxu0 %v1788_v25 }
 0x206   :  { %v882_v46 = vrot.slane %v881_v42, 1  ;;  %1659 = vmatprep.subr.bf16.mxu0 %v1789_v27 }
 0x208   :  { %v883_v47 = vadd.f32 %v882_v46, %v881_v42  ;;  %v1791_v46 = vld [vmem:[%s2257_s6 + $0x78] sm:$0xff]  }
 0x20a   :  { %884 = vrot.lane.b32.xlu0 %v883_v47, %s1834_s19 }
 0x27c   :  { %v885_v48 = vpop.permute.xlu0 %884 }
 0x27d   :  { %v886_v49 = vadd.f32 %v885_v48, %v883_v47  ;;  %v1792_v47 = vld [vmem:[%s2257_s6 + $0x38] sm:$0xff]  }
 0x27f   :  { %v887_v50 = vmul.f32 0.015625, %v886_v49 }
 0x281   :  { %v891_v51 = vrot.slane %v887_v50, %v1989_v53 }
 0x283   :  { %v892_v55 = vsub.f32 %v861_v28, %v891_v51  ;;  %v893_v56 = vsub.f32 %v864_v26, %v891_v51  ;;  %v894_v57 = vsub.f32 %v869_v35, %v891_v51  ;;  %v895_v58 = vsub.f32 %v872_v38, %v891_v51  ;;  %v1790_v28 = vld [vmem:[%s2257_s6 + $0x30] sm:$0xff]   ;;  %v1576_v35 = vld [vmem:[%s2256_s5] ss:$0 sm:$0xff]  ;;  %s1840_s5 = smov 32  }
 0x284   :  { %1660 = vmatpush3.bf16.msra.mxu0 %v1790_v28 }
 0x285   :  { %v896_v59 = vmul.f32 %v892_v55, %v892_v55  ;;  %v897_v60 = vmul.f32 %v893_v56, %v893_v56  ;;  %v898_v61 = vmul.f32 %v894_v57, %v894_v57  ;;  %v899_v63 = vmul.f32 %v895_v58, %v895_v58  ;;  %1661 = vmatprep.subr.bf16.mxu0 %v1791_v46 }
 0x287   :  { %v900_v62 = vadd.f32 %v897_v60, %v896_v59 }
 0x288   :  { %1662 = vmatpush3.bf16.msra.mxu0 %v1792_v47 }
 0x289   :  { %v901_v0 = vadd.f32 %v900_v62, %v898_v61 }
 0x28b   :  { %v902_v2 = vadd.f32 %v901_v0, %v899_v63 }
 0x28d   :  { %v903_v3 = vrot.slane %v902_v2, 4 }
 0x28f   :  { %v904_v5 = vadd.f32 %v903_v3, %v902_v2 }
 0x291   :  { %v905_v54 = vrot.slane %v904_v5, 2 }
 0x293   :  { %v906_v7 = vadd.f32 %v905_v54, %v904_v5 }
 0x295   :  { %v907_v10 = vrot.slane %v906_v7, 1 }
 0x297   :  { %v908_v11 = vadd.f32 %v907_v10, %v906_v7 }
 0x299   :  { %909 = vrot.lane.b32.xlu1 %v908_v11, %s1834_s19 }
 0x30b   :  { %v910_v30 = vpop.permute.xlu1 %909 }
 0x30c   :  { %v911_v26 = vadd.f32 %v910_v30, %v908_v11 }
 0x30e   :  { %v912_v29 = vmul.f32 0.015625, %v911_v26 }
 0x310   :  { %v914_v31 = vadd.f32 1e-05, %v912_v29 }
 0x312   :  { %1805 = vrsqrt.f32 %v914_v31 }
 0x31c   :  { %v1806_v52 = vpop.eup %1805 }
 0x31d   :  { %v916_v33 = vmul.f32 %v1806_v52, %v913_v32 }
 0x31f   :  { %v921_v34 = vrot.slane %v916_v33, %v1989_v53 }
 0x321   :  { %v923_v36 = vmul.f32 %v921_v34, %v892_v55  ;;  %v924_v37 = vmul.f32 %v921_v34, %v893_v56  ;;  %v925_v38 = vmul.f32 %v921_v34, %v894_v57  ;;  %v926_v41 = vmul.f32 %v921_v34, %v895_v58 }
 0x323   :  { %v934_v43 = vadd.f32 %v1576_v35, %v923_v36  ;;  %v935_v44 = vadd.f32 %v1576_v35, %v924_v37  ;;  %v936_v45 = vadd.f32 %v1576_v35, %v925_v38  ;;  %v937_v42 = vadd.f32 %v1576_v35, %v926_v41 }
 0x325   :  { %vm938_vm12 = vcmp.ge.f32.partialorder %v934_v43, 0.0  ;;  %vm939_vm13 = vcmp.ge.f32.partialorder %v935_v44, 0.0  ;;  %vm940_vm14 = vcmp.ge.f32.partialorder %v936_v45, 0.0  ;;  %v942_v48 = vmul.f32 0.2, %v934_v43 }
 0x326   :  { %v943_v49 = vmul.f32 0.2, %v935_v44  ;;  %v944_v50 = vmul.f32 0.2, %v936_v45  ;;  %vm941_vm15 = vcmp.ge.f32.partialorder %v937_v42, 0.0 }
 0x327   :  { %v946_v51 = vsel %vm938_vm12, %v934_v43, %v942_v48  ;;  %v945_v55 = vmul.f32 0.2, %v937_v42 }
 0x328   :  { %v947_v56 = vsel %vm939_vm13, %v935_v44, %v943_v49  ;;  %v948_v57 = vsel %vm940_vm14, %v936_v45, %v944_v50  ;;  %v971_v58 = vrot.slane %v946_v51, 1  ;;  %v956_v59 = vrot.slane %v946_v51, 7 }
 0x329   :  { %v972_v60 = vrot.slane %v947_v56, 1  ;;  %v974_v61 = vrot.slane %v948_v57, 1  ;;  %v949_v62 = vsel %vm941_vm15, %v937_v42, %v945_v55  ;;  %v957_v63 = vrot.slane %v947_v56, 7 }
 0x32a   :  { %v951_v0 = vrot.slane %v949_v62, 7  ;;  %v976_v2 = vrot.slane %v949_v62, 1  ;;  %v959_v3 = vrot.slane %v948_v57, 7  ;;  %v1025_v10 = vpack.c.bf16 %v947_v56, %v946_v51 }
 0x32b   :  { %v973_v5 = vsel %vm539_vm10, %v971_v58, %v972_v60  ;;  %v975_v54 = vsel %vm539_vm10, %v972_v60, %v974_v61  ;;  %v958_v7 = vsel %vm502_vm11, %v956_v59, %v957_v63  ;;  %v1027_v30 = vpack.c.bf16 %v949_v62, %v948_v57 }
 0x32c   :  { %v984_v11 = vmul.f32 %v973_v5, %v2014_v8  ;;  %v985_v12 = vmul.f32 %v975_v54, %v2019_v20  ;;  %v966_v13 = vsel %vm502_vm11, %v951_v0, %v956_v59  ;;  %v968_v14 = vmul.f32 %v958_v7, %v2021_v21 }
 0x32d   :  { %v967_v15 = vmul.f32 %v966_v13, %v2016_v9  ;;  %v977_v16 = vsel %vm539_vm10, %v974_v61, %v976_v2  ;;  %v983_v17 = vsel %vm539_vm10, %v976_v2, %v971_v58  ;;  %v960_v18 = vsel %vm502_vm11, %v957_v63, %v959_v3 }
 0x32e   :  { %v1710_v19 = vpack.i.bf16 %v985_v12, %v984_v11  ;;  %v986_v22 = vmul.f32 %v977_v16, %v2025_v40  ;;  %v987_v23 = vmul.f32 %v983_v17, %v2023_v39  ;;  %v961_v24 = vsel %vm502_vm11, %v959_v3, %v951_v0 }
 0x32f   :  { %v1705_v25 = vpack.i.bf16 %v968_v14, %v967_v15  ;;  %v969_v27 = vmul.f32 %v960_v18, %v2043_v6  ;;  %v970_v28 = vmul.f32 %v961_v24, %v2040_v4 }
 0x330   :  { %1711 = vrot.lane.b32.xlu1 %v1710_v19, %s1834_s19  ;;  %v1720_v26 = vpack.i.bf16 %v987_v23, %v986_v22 }
 0x331   :  { %1706 = vrot.lane.b32.xlu0 %v1705_v25, %s1834_s19  ;;  %v1715_v29 = vpack.i.bf16 %v970_v28, %v969_v27 }
 0x334   :  { %1721 = vrot.lane.b32.xlu1 %v1720_v26, %s1834_s19 }
 0x335   :  { %1716 = vrot.lane.b32.xlu0 %v1715_v29, %s1834_s19 }
 0x3a2   :  { %v1712_v31 = vpop.permute.xlu1 %1711 }
 0x3a3   :  { %v1714_v32 = vunpack.i.h.bf16 %v1712_v31  ;;  %v1713_v52 = vunpack.i.l.bf16 %v1712_v31  ;;  %v1707_v33 = vpop.permute.xlu0 %1706 }
 0x3a4   :  { %v1709_v34 = vunpack.i.h.bf16 %v1707_v33  ;;  %v1708_v35 = vunpack.i.l.bf16 %v1707_v33 }
 0x3a6   :  { %v1722_v36 = vpop.permute.xlu1 %1721  ;;  %v1021_v37 = vsel %vm1020_vm0, %v1708_v35, %v1713_v52  ;;  %v1022_v38 = vsel %vm1020_vm0, %v1709_v34, %v1714_v32 }
 0x3a7   :  { %v1724_v41 = vunpack.i.h.bf16 %v1722_v36  ;;  %v1723_v43 = vunpack.i.l.bf16 %v1722_v36  ;;  %v1717_v44 = vpop.permute.xlu0 %1716  ;;  %v1026_v45 = vpack.c.bf16 %v1022_v38, %v1021_v37 }
 0x3a8   :  { %v1719_v42 = vunpack.i.h.bf16 %v1717_v44  ;;  %v1718_v46 = vunpack.i.l.bf16 %v1717_v44  ;;  %v1794_v44 = vld [vmem:[%s2260_s9 + $0x8] sm:$0xff]  }
 0x3a9   :  { %1189 = vmatprep.mubr.bf16.mxu0 %v1026_v45  ;;  %v1795_v45 = vld [vmem:[%s2260_s9 + $0x10] sm:$0xff]  }
 0x3aa   :  { %1190 = vmatmul.mubr.bf16.vlgmr.msra.gmra.mrb[20].mxu0 %v1025_v10  ;;  %v1023_v47 = vsel %vm1020_vm0, %v1718_v46, %v1723_v43  ;;  %v1024_v48 = vsel %vm1020_vm0, %v1719_v42, %v1724_v41  ;;  %v1793_v43 = vld [vmem:[%s2260_s9] sm:$0xff]   ;;  %v1796_v42 = vld [vmem:[%s2260_s9 + $0x18] sm:$0xff]  }
 0x3ab   :  { %v1028_v49 = vpack.c.bf16 %v1024_v48, %v1023_v47  ;;  %1479 = vmatpush1.bf16.msra.mxu1 %v1793_v43  ;;  %v1797_v46 = vld [vmem:[%s2260_s9 + $0x20] sm:$0xff]   ;;  %v1798_v47 = vld [vmem:[%s2260_s9 + $0x28] sm:$0xff]   ;;  %v1799_v48 = vld [vmem:[%s2260_s9 + $0x30] sm:$0xff]  }
 0x3ac   :  { %1480 = vmatprep.subr.bf16.mxu1 %v1836_v1 }
 0x3ad   :  { %1197 = vmatprep.mubr.bf16.mxu0 %v1028_v49  ;;  %v1800_v49 = vld [vmem:[%s2260_s9 + $0x38] sm:$0xff]  }
 0x3af   :  { %1481 = vmatpush1.bf16.msra.mxu1 %v1794_v44 }
 0x3b0   :  { %1482 = vmatprep.subr.bf16.mxu1 %v1836_v1 }
 0x3b2   :  { %1198 = vmatmul.mubr.bf16.gmra.mrb[24].mxu0 %v1027_v30 }
 0x3b3   :  { %1483 = vmatpush1.bf16.msra.mxu1 %v1795_v45 }
 0x3b4   :  { %1484 = vmatprep.subr.bf16.mxu1 %v1836_v1 }
 0x3b7   :  { %1485 = vmatpush1.bf16.msra.mxu1 %v1796_v42 }
 0x3b8   :  { %1486 = vmatprep.subr.bf16.mxu1 %v1836_v1 }
 0x3bb   :  { %1487 = vmatpush1.bf16.msra.mxu1 %v1797_v46 }
 0x3bc   :  { %1488 = vmatprep.subr.bf16.mxu1 %v1836_v1 }
 0x3bf   :  { %1489 = vmatpush1.bf16.msra.mxu1 %v1798_v47 }
 0x3c0   :  { %1490 = vmatprep.subr.bf16.mxu1 %v1836_v1 }
 0x3c3   :  { %1491 = vmatpush1.bf16.msra.mxu1 %v1799_v48 }
 0x3c4   :  { %1492 = vmatprep.subr.bf16.mxu1 %v1836_v1 }
 0x3c7   :  { %1493 = vmatpush1.bf16.msra.mxu1 %v1800_v49 }
 0x3c8   :  { %1494 = vmatprep.subr.bf16.mxu1 %v1836_v1 }
 0x47d   :  { %v1663_v50 = vpop.f32.mrb[20].mxu0 }
 0x47e   :  { %v1664_v51 = vpop.f32.mrb[21].mxu0 }
 0x47f   :  { %v1665_v55 = vadd.f32 %v1664_v51, %v1663_v50  ;;  %v1666_v56 = vpop.f32.mrb[22].mxu0  ;;  %v1801_v50 = vld [vmem:[%s2260_s9 + $0x40] sm:$0xff]   ;;  %v1802_v51 = vld [vmem:[%s2260_s9 + $0x48] sm:$0xff]  }
 0x480   :  { %v1667_v57 = vpop.f32.mrb[23].mxu0  ;;  %1495 = vmatpush1.bf16.msra.mxu1 %v1801_v50 }
 0x481   :  { %v1668_v58 = vadd.f32 %v1667_v57, %v1666_v56  ;;  %1496 = vmatprep.subr.bf16.mxu1 %v1836_v1 }
 0x483   :  { %v1206_v61 = vadd.f32 %v1668_v58, %v1665_v55 }
 0x484   :  { %1497 = vmatpush1.bf16.msra.mxu1 %v1802_v51 }
 0x485   :  { %v1669_v59 = vpop.f32.mrb[24].mxu0  ;;  %1498 = vmatprep.subr.bf16.mxu1 %v1836_v1 }
 0x486   :  { %v1670_v60 = vpop.f32.mrb[25].mxu0 }
 0x487   :  { %v1671_v62 = vadd.f32 %v1670_v60, %v1669_v59  ;;  %v1672_v63 = vpop.f32.mrb[26].mxu0  ;;  %v1250_v60 = vld [vmem:[%s2258_s7] sm:$0x1] }
 0x488   :  { %v1673_v0 = vpop.f32.mrb[27].mxu0 }
 0x489   :  { %v1207_v2 = vadd.f32 %v1671_v62, %v1206_v61  ;;  %v1674_v3 = vadd.f32 %v1673_v0, %v1672_v63  ;;  %v1593_v0 = vld [vmem:[%s2259_s8] ss:$0 sm:$0xff] }
 0x48b   :  { %v1208_v5 = vadd.f32 %v1674_v3, %v1207_v2 }
 0x48d   :  { %v1209_v54 = vrot.slane %v1208_v5, 4 }
 0x48f   :  { %v1210_v7 = vadd.f32 %v1209_v54, %v1208_v5 }
 0x491   :  { %v1211_v10 = vrot.slane %v1210_v7, 2 }
 0x493   :  { %v1212_v11 = vadd.f32 %v1211_v10, %v1210_v7 }
 0x495   :  { %v1213_v12 = vrot.slane %v1212_v11, 1 }
 0x497   :  { %v1214_v13 = vadd.f32 %v1213_v12, %v1212_v11 }
 0x499   :  { %1215 = vrot.lane.b32.xlu0 %v1214_v13, %s1834_s19 }
 0x50b   :  { %v1216_v14 = vpop.permute.xlu0 %1215 }
 0x50c   :  { %v1217_v15 = vadd.f32 %v1216_v14, %v1214_v13 }
 0x50e   :  { %1218 = vrot.lane.b32.xlu1 %v1217_v15, %s1840_s5 }
 0x580   :  { %v1219_v16 = vpop.permute.xlu1 %1218 }
 0x581   :  { %v1220_v17 = vadd.f32 %v1219_v16, %v1217_v15  ;;  %v1804_v16 = vld [vmem:[%s2260_s9 + $0x58] sm:$0xff]  }
 0x583   :  { %v1221_v18 = vmul.f32 0.0078125, %v1220_v17 }
 0x585   :  { %v1225_v19 = vrot.slane %v1221_v18, %v1989_v53 }
 0x587   :  { %v2132_v22 = vsub.f32 %v1665_v55, %v1225_v19  ;;  %v2134_v23 = vsub.f32 %v1668_v58, %v1225_v19  ;;  %v2136_v24 = vsub.f32 %v1671_v62, %v1225_v19  ;;  %v2138_v25 = vsub.f32 %v1674_v3, %v1225_v19  ;;  %v1803_v55 = vld [vmem:[%s2260_s9 + $0x50] sm:$0xff]  }
 0x588   :  { %1499 = vmatpush1.bf16.msra.mxu1 %v1803_v55 }
 0x589   :  { %v1230_v27 = vmul.f32 %v2132_v22, %v2132_v22  ;;  %v1231_v28 = vmul.f32 %v2134_v23, %v2134_v23  ;;  %v1232_v30 = vmul.f32 %v2136_v24, %v2136_v24  ;;  %v1233_v29 = vmul.f32 %v2138_v25, %v2138_v25  ;;  %1500 = vmatprep.subr.bf16.mxu1 %v1836_v1 }
 0x58b   :  { %v1234_v26 = vadd.f32 %v1231_v28, %v1230_v27 }
 0x58c   :  { %1501 = vmatpush1.bf16.msra.mxu1 %v1804_v16 }
 0x58d   :  { %v1235_v31 = vadd.f32 %v1234_v26, %v1232_v30 }
 0x58f   :  { %v1236_v32 = vadd.f32 %v1235_v31, %v1233_v29 }
 0x591   :  { %v1237_v52 = vrot.slane %v1236_v32, 4 }
 0x593   :  { %v1238_v33 = vadd.f32 %v1237_v52, %v1236_v32 }
 0x595   :  { %v1239_v34 = vrot.slane %v1238_v33, 2 }
 0x597   :  { %v1240_v35 = vadd.f32 %v1239_v34, %v1238_v33 }
 0x599   :  { %v1241_v36 = vrot.slane %v1240_v35, 1 }
 0x59b   :  { %v1242_v37 = vadd.f32 %v1241_v36, %v1240_v35 }
 0x59d   :  { %1243 = vrot.lane.b32.xlu0 %v1242_v37, %s1834_s19 }
 0x60f   :  { %v1244_v38 = vpop.permute.xlu0 %1243 }
 0x610   :  { %v1245_v41 = vadd.f32 %v1244_v38, %v1242_v37 }
 0x612   :  { %1246 = vrot.lane.b32.xlu1 %v1245_v41, %s1840_s5 }
 0x684   :  { %v1247_v56 = vpop.permute.xlu1 %1246 }
 0x685   :  { %v1248_v57 = vadd.f32 %v1247_v56, %v1245_v41 }
 0x687   :  { %v1249_v58 = vmul.f32 0.0078125, %v1248_v57 }
 0x689   :  { %v1251_v59 = vadd.f32 1e-05, %v1249_v58 }
 0x68b   :  { %1807 = vrsqrt.f32 %v1251_v59 }
 0x695   :  { %v1808_v61 = vpop.eup %1807 }
 0x696   :  { %v1253_v62 = vmul.f32 %v1808_v61, %v1250_v60 }
 0x698   :  { %v1258_v63 = vrot.slane %v1253_v62, %v1989_v53 }
 0x69a   :  { %v1260_v2 = vmul.f32 %v1258_v63, %v2132_v22  ;;  %v1261_v1 = vmul.f32 %v1258_v63, %v2134_v23  ;;  %v1262_v3 = vmul.f32 %v1258_v63, %v2136_v24  ;;  %v1263_v5 = vmul.f32 %v1258_v63, %v2138_v25 }
 0x69c   :  { %v1271_v54 = vadd.f32 %v1593_v0, %v1260_v2  ;;  %v1272_v7 = vadd.f32 %v1593_v0, %v1261_v1  ;;  %v1273_v10 = vadd.f32 %v1593_v0, %v1262_v3  ;;  %v1274_v11 = vadd.f32 %v1593_v0, %v1263_v5 }
 0x69e   :  { %vm1275_vm2 = vcmp.ge.f32.partialorder %v1271_v54, 0.0  ;;  %vm1276_vm3 = vcmp.ge.f32.partialorder %v1272_v7, 0.0  ;;  %vm1277_vm4 = vcmp.ge.f32.partialorder %v1273_v10, 0.0  ;;  %v1279_v53 = vmul.f32 0.2, %v1271_v54 }
 0x69f   :  { %v1280_v12 = vmul.f32 0.2, %v1272_v7  ;;  %v1281_v13 = vmul.f32 0.2, %v1273_v10  ;;  %vm1278_vm5 = vcmp.ge.f32.partialorder %v1274_v11, 0.0 }
 0x6a0   :  { %v2205_v14 = vsel %vm1275_vm2, %v1271_v54, %v1279_v53  ;;  %v1282_v15 = vmul.f32 0.2, %v1274_v11 }
 0x6a1   :  { %v1284_v17 = vsel %vm1276_vm3, %v1272_v7, %v1280_v12  ;;  %v1285_v18 = vsel %vm1277_vm4, %v1273_v10, %v1281_v13  ;;  %v1308_v19 = vrot.slane %v2205_v14, 1  ;;  %v1293_v22 = vrot.slane %v2205_v14, 7 }
 0x6a2   :  { %v1309_v23 = vrot.slane %v1284_v17, 1  ;;  %v1311_v24 = vrot.slane %v1285_v18, 1  ;;  %v1286_v25 = vsel %vm1278_vm5, %v1274_v11, %v1282_v15  ;;  %v1294_v27 = vrot.slane %v1284_v17, 7 }
 0x6a3   :  { %v1288_v28 = vrot.slane %v1286_v25, 7  ;;  %v1313_v30 = vrot.slane %v1286_v25, 1  ;;  %v1296_v26 = vrot.slane %v1285_v18, 7  ;;  %v1362_v29 = vpack.c.bf16 %v1284_v17, %v2205_v14 }
 0x6a4   :  { %v1310_v31 = vsel %vm539_vm10, %v1308_v19, %v1309_v23  ;;  %v1312_v32 = vsel %vm539_vm10, %v1309_v23, %v1311_v24  ;;  %v1295_v52 = vsel %vm502_vm11, %v1293_v22, %v1294_v27  ;;  %v1364_v33 = vpack.c.bf16 %v1286_v25, %v1285_v18 }
 0x6a5   :  { %v1321_v34 = vmul.f32 %v1310_v31, %v2014_v8  ;;  %v1322_v35 = vmul.f32 %v1312_v32, %v2019_v20  ;;  %v1303_v36 = vsel %vm502_vm11, %v1288_v28, %v1293_v22  ;;  %v1305_v37 = vmul.f32 %v1295_v52, %v2021_v21 }
 0x6a6   :  { %v1304_v38 = vmul.f32 %v1303_v36, %v2016_v9  ;;  %v1314_v41 = vsel %vm539_vm10, %v1311_v24, %v1313_v30  ;;  %v1320_v43 = vsel %vm539_vm10, %v1313_v30, %v1308_v19  ;;  %v1297_v44 = vsel %vm502_vm11, %v1294_v27, %v1296_v26 }
 0x6a7   :  { %v1730_v45 = vpack.i.bf16 %v1322_v35, %v1321_v34  ;;  %v1323_v42 = vmul.f32 %v1314_v41, %v2025_v40  ;;  %v1324_v46 = vmul.f32 %v1320_v43, %v2023_v39  ;;  %v1298_v8 = vsel %vm502_vm11, %v1296_v26, %v1288_v28  ;;  %v1594_v40 = vld [vmem:[#allocation2] ss:$0 sm:$0xff] }
 0x6a8   :  { %v1725_v20 = vpack.i.bf16 %v1305_v37, %v1304_v38  ;;  %v1306_v47 = vmul.f32 %v1297_v44, %v2043_v6  ;;  %v1307_v21 = vmul.f32 %v1298_v8, %v2040_v4 }
 0x6a9   :  { %1731 = vrot.lane.b32.xlu1 %v1730_v45, %s1840_s5  ;;  %v1740_v9 = vpack.i.bf16 %v1324_v46, %v1323_v42 }
 0x6aa   :  { %1726 = vrot.lane.b32.xlu0 %v1725_v20, %s1840_s5  ;;  %v1735_v48 = vpack.i.bf16 %v1307_v21, %v1306_v47 }
 0x6ad   :  { %1741 = vrot.lane.b32.xlu1 %v1740_v9, %s1840_s5 }
 0x6ae   :  { %1736 = vrot.lane.b32.xlu0 %v1735_v48, %s1840_s5 }
 0x6b2   :  { %1397 = vperm.xlu0 %1703, %v1594_v40  }
 0x71b   :  { %v1732_v39 = vpop.permute.xlu1 %1731 }
 0x71c   :  { %v1734_v49 = vunpack.i.h.bf16 %v1732_v39  ;;  %v1733_v50 = vunpack.i.l.bf16 %v1732_v39  ;;  %v1727_v51 = vpop.permute.xlu0 %1726 }
 0x71d   :  { %v1729_v6 = vunpack.i.h.bf16 %v1727_v51  ;;  %v1728_v55 = vunpack.i.l.bf16 %v1727_v51 }
 0x71f   :  { %v1359_v4 = vsel %vm1357_vm6, %v1729_v6, %v1734_v49  ;;  %v1358_v56 = vsel %vm1357_vm6, %v1728_v55, %v1733_v50  ;;  %v1742_v57 = vpop.permute.xlu1 %1741 }
 0x720   :  { %v1363_v58 = vpack.c.bf16 %v1359_v4, %v1358_v56  ;;  %v1744_v59 = vunpack.i.h.bf16 %v1742_v57  ;;  %v1743_v60 = vunpack.i.l.bf16 %v1742_v57  ;;  %v1737_v61 = vpop.permute.xlu0 %1736 }
 0x721   :  { %v1739_v62 = vunpack.i.h.bf16 %v1737_v61  ;;  %v1738_v63 = vunpack.i.l.bf16 %v1737_v61 }
 0x722   :  { %1607 = vmatprep.mubr.msk.bf16.mxu1 %vm1020_vm0, %v1363_v58 }
 0x723   :  { %v1361_v0 = vsel %vm1357_vm6, %v1739_v62, %v1744_v59  ;;  %v1360_v2 = vsel %vm1357_vm6, %v1738_v63, %v1743_v60  ;;  %1511 = vmatmul.mubr.bf16.vlgmr.msra.gmra.mrb[8].mxu1 %v1362_v29 }
 0x724   :  { %v1365_v1 = vpack.c.bf16 %v1361_v0, %v1360_v2 }
 0x726   :  { %1608 = vmatprep.mubr.msk.bf16.mxu1 %vm1020_vm0, %v1365_v1 }
 0x72b   :  { %1519 = vmatmul.mubr.bf16.gmra.mrb[12].mxu1 %v1364_v33 }
 0x731   :  { %v1398_v3 = vpop.permute.xlu0 %1397 }
 0x7f6   :  { %v1512_v5 = vpop.f32.mrb[8].mxu1 }
 0x7f7   :  { %v1513_v54 = vadd.f32 %v1512_v5, %v1398_v3  ;;  %v1514_v7 = vpop.f32.mrb[9].mxu1 }
 0x7f8   :  { %v1515_v10 = vpop.f32.mrb[10].mxu1 }
 0x7f9   :  { %1527 = vst.msk [vmem:[%s2264_s13] sm:$0xff] %vm136_vm1, %v1513_v54  ;;  %v1516_v11 = vadd.f32 %v1515_v10, %v1398_v3  ;;  %v1517_v53 = vpop.f32.mrb[11].mxu1 }
 0x7fb   :  { %1528 = vst.msk [vmem:[%s2264_s13 + $0x8] sm:$0xff] %vm136_vm1, %v1516_v11 }
 0x7fe   :  { %v1520_v12 = vpop.f32.mrb[12].mxu1 }
 0x7ff   :  { %v1521_v13 = vadd.f32 %v1520_v12, %v1398_v3  ;;  %v1522_v14 = vpop.f32.mrb[13].mxu1 }
 0x800   :  { %v1523_v15 = vpop.f32.mrb[14].mxu1 }
 0x801   :  { %1529 = vst.msk [vmem:[%s2264_s13 + $0x10] sm:$0xff] %vm136_vm1, %v1521_v13  ;;  %v1524_v16 = vadd.f32 %v1523_v15, %v1398_v3  ;;  %v1525_v17 = vpop.f32.mrb[15].mxu1 }
 0x803   :  { %1530 = vst.msk [vmem:[%s2264_s13 + $0x18] sm:$0xff] %vm136_vm1, %v1524_v16 }
 0x804   :  { %1535 = vsyncpa [#allocation4], 1 }

</bundles_post_ra>
